<compile_context>
chip_gen: v7x
topology: tpu7x:2x2x1
jax: 0.10.0
libtpu: 0.0.40
codegen_flags: <defaults>
</compile_context>

<pallas_src>
import functools

import numpy as np
import jax
import jax.numpy as jnp
from jax import lax
from jax.experimental import pallas as pl
from jax.experimental.pallas import tpu as pltpu

_EPS = 1e-6


def _round_up(x: int, m: int) -> int:
    return (x + m - 1) // m * m


def _folded_affine(sums, sqs, w, b, ms, inv_cnt):
    """Fold GraphNorm into a per-graph affine:  out = x * A[g] + C[g].

    mean = sum/n ;  E[x^2] = sq/n
    var  = E[(x - ms*mean)^2] = E[x^2] - (2*ms - ms^2)*mean^2   (clamped >= 0)
    A    = w * rsqrt(var + eps) ;  C = b - A * ms * mean
    """
    mean = sums * inv_cnt                                   # (B, H)
    ex2 = sqs * inv_cnt                                     # (B, H)
    var = jnp.maximum(ex2 - (2.0 * ms - ms * ms) * mean * mean, 0.0)
    a = w * lax.rsqrt(var + _EPS)                           # EUP rsqrt
    c = b - a * ms * mean
    return a, c


# --------------------------------------------------------------------------
# Pass 1 (tiled): per-graph sum(x), sum(x^2) -> folded affine (A, C), (B, H)
# --------------------------------------------------------------------------
def _stats_kernel(x_ref, seg_ref, w_ref, b_ref, ms_ref, icnt_ref,
                  a_ref, c_ref, *, num_graphs: int, total_rows: int,
                  mask_rows: bool):
    i = pl.program_id(0)
    tm = x_ref.shape[0]

    @pl.when(i == 0)
    def _():
        a_ref[...] = jnp.zeros_like(a_ref)    # running sum(x)
        c_ref[...] = jnp.zeros_like(c_ref)    # running sum(x*x)

    x = x_ref[...].astype(jnp.float32)                       # (TM, H)
    if mask_rows:
        # Zero out-of-range rows of the ragged last tile (garbage * 0 can be
        # NaN, so masking only the one-hot is not enough).
        ridx = lax.broadcasted_iota(jnp.int32, (tm, 1), 0) + i * tm
        x = jnp.where(ridx < total_rows, x, 0.0)

    seg = seg_ref[...]                                       # (1, TM) int32
    gids = lax.broadcasted_iota(jnp.int32, (num_graphs, tm), 0)
    onehot = (gids == seg).astype(jnp.float32)               # (B, TM), vregs

    a_ref[...] += jnp.dot(onehot, x, preferred_element_type=jnp.float32)
    c_ref[...] += jnp.dot(onehot, x * x, preferred_element_type=jnp.float32)

    @pl.when(i == pl.num_programs(0) - 1)
    def _():
        a, c = _folded_affine(a_ref[...], c_ref[...], w_ref[...], b_ref[...],
                              ms_ref[...], icnt_ref[...])
        a_ref[...] = a
        c_ref[...] = c


# --------------------------------------------------------------------------
# Pass 2 (tiled): normalize  o = x * A[seg] + C[seg]
# --------------------------------------------------------------------------
def _norm_kernel(x_ref, seg_ref, a_ref, c_ref, o_ref, *, num_graphs: int):
    x = x_ref[...].astype(jnp.float32)                       # (TM, H)
    tm = x.shape[0]
    seg = seg_ref[...]                                       # (1, TM)
    gids = lax.broadcasted_iota(jnp.int32, (num_graphs, tm), 0)
    onehot = (gids == seg).astype(jnp.float32)               # (B, TM)
    dims = (((0,), (0,)), ((), ()))                          # contract B dim
    a_n = lax.dot_general(onehot, a_ref[...], dims,
                          preferred_element_type=jnp.float32)    # (TM, H)
    c_n = lax.dot_general(onehot, c_ref[...], dims,
                          preferred_element_type=jnp.float32)
    o_ref[...] = (x * a_n + c_n).astype(o_ref.dtype)         # one FMA / elem


# --------------------------------------------------------------------------
# Fused path (small N): x resident in VMEM, one read + one write of x
# --------------------------------------------------------------------------
def _fused_kernel(x_ref, seg_ref, w_ref, b_ref, ms_ref, icnt_ref, o_ref, *,
                  num_graphs: int):
    x = x_ref[...].astype(jnp.float32)                       # (N, H)
    n = x.shape[0]
    seg = seg_ref[...]                                       # (1, N)
    gids = lax.broadcasted_iota(jnp.int32, (num_graphs, n), 0)
    onehot = (gids == seg).astype(jnp.float32)               # (B, N)
    sums = jnp.dot(onehot, x, preferred_element_type=jnp.float32)
    sqs = jnp.dot(onehot, x * x, preferred_element_type=jnp.float32)
    a, c = _folded_affine(sums, sqs, w_ref[...], b_ref[...], ms_ref[...],
                          icnt_ref[...])
    dims = (((0,), (0,)), ((), ()))
    a_n = lax.dot_general(onehot, a, dims, preferred_element_type=jnp.float32)
    c_n = lax.dot_general(onehot, c, dims, preferred_element_type=jnp.float32)
    o_ref[...] = (x * a_n + c_n).astype(o_ref.dtype)


# --------------------------------------------------------------------------
# Wrapper
# --------------------------------------------------------------------------
def graph_norm(batch_list, x, weight, bias, mean_scale, *,
               row_tile_bytes=1 << 20, max_tile_rows=4096, min_grid_steps=4,
               fused_bytes_limit=8 << 20, force_tiled=False):
    """GraphNorm 'gn' forward.  batch_list: static python/np graph sizes.
    x: (N, H) with N == sum(batch_list).  Output dtype == x.dtype."""
    batch_list = np.asarray(batch_list, dtype=np.int64)
    N, H = x.shape
    B = int(batch_list.shape[0])
    assert int(batch_list.sum()) == N
    assert np.all(batch_list > 0), "graphs with zero nodes are not supported"

    esize = x.dtype.itemsize
    out_dtype = x.dtype

    w2 = weight.reshape(1, H).astype(jnp.float32)
    b2 = bias.reshape(1, H).astype(jnp.float32)
    ms2 = mean_scale.reshape(1, H).astype(jnp.float32)
    icnt = jnp.asarray((1.0 / batch_list).astype(np.float32)).reshape(B, 1)

    seg_rows = np.repeat(np.arange(B, dtype=np.int32), batch_list)

    # ---------------- fused small-N path (x resident in VMEM) --------------
    fused_vmem = N * H * (2 * esize + 3 * 4) + 2 * B * N * 4 + 4 * B * H * 4
    if not force_tiled and fused_vmem <= fused_bytes_limit:
        seg = jnp.asarray(seg_rows.reshape(1, N))
        vmem_limit = int(min(64 << 20, max(16 << 20, 2 * fused_vmem)))
        return pl.pallas_call(
            functools.partial(_fused_kernel, num_graphs=B),
            out_shape=jax.ShapeDtypeStruct((N, H), out_dtype),
            grid_spec=pltpu.PrefetchScalarGridSpec(
                num_scalar_prefetch=0,
                grid=(1,),
                in_specs=[
                    pl.BlockSpec((N, H), lambda i: (0, 0)),   # x (whole)
                    pl.BlockSpec((1, N), lambda i: (0, 0)),   # segment ids
                    pl.BlockSpec((1, H), lambda i: (0, 0)),   # weight
                    pl.BlockSpec((1, H), lambda i: (0, 0)),   # bias
                    pl.BlockSpec((1, H), lambda i: (0, 0)),   # mean_scale
                    pl.BlockSpec((B, 1), lambda i: (0, 0)),   # 1/count
                ],
                out_specs=pl.BlockSpec((N, H), lambda i: (0, 0)),
            ),
            compiler_params=pltpu.CompilerParams(
                dimension_semantics=("arbitrary",),
                vmem_limit_bytes=vmem_limit),
            cost_estimate=pl.CostEstimate(
                flops=int(8 * N * B * H + 5 * N * H + 10 * B * H),
                transcendentals=int(B * H),
                bytes_accessed=int(2 * N * H * esize + N * 4)),
        )(x, seg, w2, b2, ms2, icnt)

    # ---------------- tiled streaming path ---------------------------------
    # Row tile: multiple of 128 (so the lane-major seg block is legal), sized
    # from a VMEM byte budget, but keep >= min_grid_steps tiles for pipelining.
    tm = max(128, (row_tile_bytes // (H * 4)) // 128 * 128)
    tm = min(tm, max_tile_rows)
    tm = min(tm, max(128, _round_up(-(-N // min_grid_steps), 128)))
    n_pad = _round_up(N, tm)
    nt = n_pad // tm
    mask_rows = (n_pad != N)

    # Per-row segment ids, lane-major.  Padded tail gets id B (matches no
    # graph); the tail x rows are additionally zero-masked in pass 1.
    seg_np = np.full((1, n_pad), B, dtype=np.int32)
    seg_np[0, :N] = seg_rows
    seg = jnp.asarray(seg_np)

    tile_bytes = tm * H * 4
    vmem_limit = int(min(64 << 20,
                         max(16 << 20,
                             8 * tile_bytes + (2 * B * H + 2 * B * tm) * 4
                             + (1 << 20))))
    cparams_red = pltpu.CompilerParams(dimension_semantics=("arbitrary",),
                                       vmem_limit_bytes=vmem_limit)
    cparams_par = pltpu.CompilerParams(dimension_semantics=("parallel",),
                                       vmem_limit_bytes=vmem_limit)

    # Pass 1: per-graph sums -> folded per-graph affine (A, C), both (B, H).
    a_g, c_g = pl.pallas_call(
        functools.partial(_stats_kernel, num_graphs=B, total_rows=N,
                          mask_rows=mask_rows),
        out_shape=(jax.ShapeDtypeStruct((B, H), jnp.float32),
                   jax.ShapeDtypeStruct((B, H), jnp.float32)),
        grid_spec=pltpu.PrefetchScalarGridSpec(
            num_scalar_prefetch=0,
            grid=(nt,),
            in_specs=[
                pl.BlockSpec((tm, H), lambda i: (i, 0)),   # x tile
                pl.BlockSpec((1, tm), lambda i: (0, i)),   # seg ids (lane-major)
                pl.BlockSpec((1, H), lambda i: (0, 0)),    # weight
                pl.BlockSpec((1, H), lambda i: (0, 0)),    # bias
                pl.BlockSpec((1, H), lambda i: (0, 0)),    # mean_scale
                pl.BlockSpec((B, 1), lambda i: (0, 0)),    # 1/count
            ],
            out_specs=[
                pl.BlockSpec((B, H), lambda i: (0, 0)),    # A (resident acc)
                pl.BlockSpec((B, H), lambda i: (0, 0)),    # C (resident acc)
            ],
        ),
        compiler_params=cparams_red,
        cost_estimate=pl.CostEstimate(
            flops=int(4 * n_pad * B * H + 3 * n_pad * H + 10 * B * H),
            transcendentals=int(B * H),
            bytes_accessed=int(N * H * esize + n_pad * 4 + 2 * B * H * 4)),
    )(x, seg, w2, b2, ms2, icnt)

    # TODO(synk): on v7x, split pass 1 across both TensorCores with a leading
    # parallel grid axis and per-core partial sums (combine in a tiny epilog).

    # Pass 2: o = x * A[seg] + C[seg]   (pure streaming, 2-TC via "parallel").
    out = pl.pallas_call(
        functools.partial(_norm_kernel, num_graphs=B),
        out_shape=jax.ShapeDtypeStruct((N, H), out_dtype),
        grid_spec=pltpu.PrefetchScalarGridSpec(
            num_scalar_prefetch=0,
            grid=(nt,),
            in_specs=[
                pl.BlockSpec((tm, H), lambda i: (i, 0)),   # x tile
                pl.BlockSpec((1, tm), lambda i: (0, i)),   # seg ids
                pl.BlockSpec((B, H), lambda i: (0, 0)),    # A
                pl.BlockSpec((B, H), lambda i: (0, 0)),    # C
            ],
            out_specs=pl.BlockSpec((tm, H), lambda i: (i, 0)),
        ),
        compiler_params=cparams_par,
        cost_estimate=pl.CostEstimate(
            flops=int(4 * n_pad * B * H + 2 * n_pad * H),
            transcendentals=0,
            bytes_accessed=int(2 * N * H * esize + n_pad * 4 + 2 * B * H * 4)),
    )(x, seg, a_g, c_g)

    return out


# --------------------------------------------------------------------------
# Pure-numpy reference matching the PyTorch GraphNorm 'gn' forward.
# --------------------------------------------------------------------------
def graph_norm_reference(batch_list, x, weight, bias, mean_scale):
    batch_list = np.asarray(batch_list, dtype=np.int64)
    x = np.asarray(x, dtype=np.float32)
    B = len(batch_list)
    seg = np.repeat(np.arange(B), batch_list)
    mean = np.zeros((B, x.shape[1]), dtype=np.float32)
    np.add.at(mean, seg, x)
    mean = mean / batch_list[:, None]
    mean_n = mean[seg]
    sub = x - mean_n * np.asarray(mean_scale, np.float32)
    std = np.zeros((B, x.shape[1]), dtype=np.float32)
    np.add.at(std, seg, sub ** 2)
    std = np.sqrt(std / batch_list[:, None] + 1e-6)
    std_n = std[seg]
    return (np.asarray(weight, np.float32) * sub / std_n
            + np.asarray(bias, np.float32))


if __name__ == "__main__":
    hidden_dim = 64

    key = jax.random.PRNGKey(0)
    kx1, kx2, kx3, kw, kb, km = jax.random.split(key, 6)

    weight = (jnp.ones((hidden_dim,), jnp.float32)
              + 0.1 * jax.random.normal(kw, (hidden_dim,), jnp.float32))
    bias = 0.1 * jax.random.normal(kb, (hidden_dim,), jnp.float32)
    mean_scale = (jnp.ones((hidden_dim,), jnp.float32)
                  + 0.1 * jax.random.normal(km, (hidden_dim,), jnp.float32))

    # Case 1: small N -> fused single-kernel path (f32 in, f32 out).
    batch_list1 = [5, 8, 11]
    N1 = int(np.sum(batch_list1))
    x1 = jax.random.normal(kx1, (N1, hidden_dim), jnp.float32)
    out1 = jax.block_until_ready(
        graph_norm(batch_list1, x1, weight, bias, mean_scale))
    ref1 = graph_norm_reference(batch_list1, np.asarray(x1), np.asarray(weight),
                                np.asarray(bias), np.asarray(mean_scale))
    np.testing.assert_allclose(np.asarray(out1), ref1, rtol=1e-4, atol=1e-5)

    # Case 2: tiled streaming path with a ragged last tile
    # (N=1000 -> tm=256, 4 grid steps, n_pad=1024 != N exercises the mask).
    batch_list2 = [137, 263, 300, 211, 89]
    N2 = int(np.sum(batch_list2))
    x2 = jax.random.normal(kx2, (N2, hidden_dim), jnp.float32)
    out2 = jax.block_until_ready(
        graph_norm(batch_list2, x2, weight, bias, mean_scale, force_tiled=True))
    ref2 = graph_norm_reference(batch_list2, np.asarray(x2), np.asarray(weight),
                                np.asarray(bias), np.asarray(mean_scale))
    np.testing.assert_allclose(np.asarray(out2), ref2, rtol=5e-4, atol=1e-4)

    # Case 3: bf16 in -> bf16 out (no f32 round trip through HBM).
    batch_list3 = [3, 7, 6, 9]
    N3 = int(np.sum(batch_list3))
    x3 = jax.random.normal(kx3, (N3, hidden_dim), jnp.float32).astype(jnp.bfloat16)
    out3 = jax.block_until_ready(
        graph_norm(batch_list3, x3, weight, bias, mean_scale))
    assert out3.dtype == jnp.bfloat16
    ref3 = graph_norm_reference(batch_list3, np.asarray(x3.astype(jnp.float32)),
                                np.asarray(weight), np.asarray(bias),
                                np.asarray(mean_scale))
    np.testing.assert_allclose(np.asarray(out3.astype(jnp.float32)), ref3,
                               rtol=5e-2, atol=5e-2)

    print("KERNEL_OK")
</pallas_src>

<mosaic_0001>
module attributes {stable_mosaic.version = 11 : i64} {
  func.func @_fused_kernel(%arg0: i32, %arg1: memref<24x64xf32, #tpu.memory_space<vmem>>, %arg2: memref<1x24xi32, #tpu.memory_space<vmem>>, %arg3: memref<1x64xf32, #tpu.memory_space<vmem>>, %arg4: memref<1x64xf32, #tpu.memory_space<vmem>>, %arg5: memref<1x64xf32, #tpu.memory_space<vmem>>, %arg6: memref<3x1xf32, #tpu.memory_space<vmem>>, %arg7: memref<24x64xf32, #tpu.memory_space<vmem>>) attributes {dimension_semantics = [#tpu.dimension_semantics<arbitrary>], iteration_bounds = array<i64: 1>, scalar_prefetch = 0 : i64, scratch_operands = 0 : i64, tpu.core_type = #tpu.core_type<tc>, window_params = [{pipeline_mode = #tpu.pipeline_mode<synchronous>, transform_indices = @transform_0, window_bounds = array<i64: 24, 64>}, {pipeline_mode = #tpu.pipeline_mode<synchronous>, transform_indices = @transform_1, window_bounds = array<i64: 1, 24>}, {pipeline_mode = #tpu.pipeline_mode<synchronous>, transform_indices = @transform_2, window_bounds = array<i64: 1, 64>}, {pipeline_mode = #tpu.pipeline_mode<synchronous>, transform_indices = @transform_3, window_bounds = array<i64: 1, 64>}, {pipeline_mode = #tpu.pipeline_mode<synchronous>, transform_indices = @transform_4, window_bounds = array<i64: 1, 64>}, {pipeline_mode = #tpu.pipeline_mode<synchronous>, transform_indices = @transform_5, window_bounds = array<i64: 3, 1>}, {pipeline_mode = #tpu.pipeline_mode<synchronous>, transform_indices = @transform_6, window_bounds = array<i64: 24, 64>}]} {
    %c0 = arith.constant 0 : index
    %c0_0 = arith.constant 0 : index
    %0 = vector.load %arg1[%c0, %c0_0] : memref<24x64xf32, #tpu.memory_space<vmem>>, vector<24x64xf32>
    %c0_1 = arith.constant 0 : index
    %c0_2 = arith.constant 0 : index
    %1 = vector.load %arg2[%c0_1, %c0_2] : memref<1x24xi32, #tpu.memory_space<vmem>>, vector<1x24xi32>
    %2 = tpu.iota {dimensions = array<i32: 0>} : vector<3x24xi32>
    %3 = vector.broadcast %1 : vector<1x24xi32> to vector<3x24xi32>
    %4 = arith.cmpi eq, %2, %3 : vector<3x24xi32>
    %5 = arith.extui %4 : vector<3x24xi1> to vector<3x24xi32>
    %6 = arith.sitofp %5 : vector<3x24xi32> to vector<3x24xf32>
    %cst = arith.constant dense<0.000000e+00> : vector<3x64xf32>
    %7 = tpu.matmul %6, %0, %cst {dimension_numbers = #tpu.dot_dimension_numbers<[1], [0], [0], [1], [0, 0, 1, 1], [], []>} : vector<3x24xf32>, vector<24x64xf32>, vector<3x64xf32> -> vector<3x64xf32>
    %8 = arith.mulf %0, %0 : vector<24x64xf32>
    %cst_3 = arith.constant dense<0.000000e+00> : vector<3x64xf32>
    %9 = tpu.matmul %6, %8, %cst_3 {dimension_numbers = #tpu.dot_dimension_numbers<[1], [0], [0], [1], [0, 0, 1, 1], [], []>} : vector<3x24xf32>, vector<24x64xf32>, vector<3x64xf32> -> vector<3x64xf32>
    %c0_4 = arith.constant 0 : index
    %c0_5 = arith.constant 0 : index
    %10 = vector.load %arg3[%c0_4, %c0_5] : memref<1x64xf32, #tpu.memory_space<vmem>>, vector<1x64xf32>
    %c0_6 = arith.constant 0 : index
    %c0_7 = arith.constant 0 : index
    %11 = vector.load %arg4[%c0_6, %c0_7] : memref<1x64xf32, #tpu.memory_space<vmem>>, vector<1x64xf32>
    %c0_8 = arith.constant 0 : index
    %c0_9 = arith.constant 0 : index
    %12 = vector.load %arg5[%c0_8, %c0_9] : memref<1x64xf32, #tpu.memory_space<vmem>>, vector<1x64xf32>
    %c0_10 = arith.constant 0 : index
    %c0_11 = arith.constant 0 : index
    %13 = vector.load %arg6[%c0_10, %c0_11] : memref<3x1xf32, #tpu.memory_space<vmem>>, vector<3x1xf32>
    %14 = vector.broadcast %13 : vector<3x1xf32> to vector<3x64xf32>
    %15 = arith.mulf %7, %14 : vector<3x64xf32>
    %16 = vector.broadcast %13 : vector<3x1xf32> to vector<3x64xf32>
    %17 = arith.mulf %9, %16 : vector<3x64xf32>
    %cst_12 = arith.constant 2.000000e+00 : f32
    %18 = vector.broadcast %cst_12 : f32 to vector<1x64xf32>
    %19 = arith.mulf %18, %12 : vector<1x64xf32>
    %20 = arith.mulf %12, %12 : vector<1x64xf32>
    %21 = arith.subf %19, %20 : vector<1x64xf32>
    %22 = vector.broadcast %21 : vector<1x64xf32> to vector<3x64xf32>
    %23 = arith.mulf %22, %15 : vector<3x64xf32>
    %24 = arith.mulf %23, %15 : vector<3x64xf32>
    %25 = arith.subf %17, %24 : vector<3x64xf32>
    %cst_13 = arith.constant 0.000000e+00 : f32
    %26 = vector.broadcast %cst_13 : f32 to vector<3x64xf32>
    %27 = arith.maximumf %25, %26 : vector<3x64xf32>
    %cst_14 = arith.constant 9.99999997E-7 : f32
    %28 = vector.broadcast %cst_14 : f32 to vector<3x64xf32>
    %29 = arith.addf %27, %28 : vector<3x64xf32>
    %30 = math.rsqrt %29 : vector<3x64xf32>
    %31 = vector.broadcast %10 : vector<1x64xf32> to vector<3x64xf32>
    %32 = arith.mulf %31, %30 : vector<3x64xf32>
    %33 = vector.broadcast %12 : vector<1x64xf32> to vector<3x64xf32>
    %34 = arith.mulf %32, %33 : vector<3x64xf32>
    %35 = arith.mulf %34, %15 : vector<3x64xf32>
    %36 = vector.broadcast %11 : vector<1x64xf32> to vector<3x64xf32>
    %37 = arith.subf %36, %35 : vector<3x64xf32>
    %cst_15 = arith.constant dense<0.000000e+00> : vector<24x64xf32>
    %38 = tpu.matmul %6, %32, %cst_15 {dimension_numbers = #tpu.dot_dimension_numbers<[0], [0], [1], [1], [0, 1, 1, 1], [], []>} : vector<3x24xf32>, vector<3x64xf32>, vector<24x64xf32> -> vector<24x64xf32>
    %cst_16 = arith.constant dense<0.000000e+00> : vector<24x64xf32>
    %39 = tpu.matmul %6, %37, %cst_16 {dimension_numbers = #tpu.dot_dimension_numbers<[0], [0], [1], [1], [0, 1, 1, 1], [], []>} : vector<3x24xf32>, vector<3x64xf32>, vector<24x64xf32> -> vector<24x64xf32>
    %40 = arith.mulf %0, %38 : vector<24x64xf32>
    %41 = arith.addf %40, %39 : vector<24x64xf32>
    %c0_17 = arith.constant 0 : index
    %c0_18 = arith.constant 0 : index
    %42 = vector.load %arg7[%c0_17, %c0_18] : memref<24x64xf32, #tpu.memory_space<vmem>>, vector<24x64xf32>
    tpu.vector_store %arg7[%c0_17, %c0_18], %41 {strides = array<i32>} : memref<24x64xf32, #tpu.memory_space<vmem>>, vector<24x64xf32>,
    return
  }
  func.func @transform_0(%arg0: i32) -> (i32, i32) {
    %c0_i32 = arith.constant 0 : i32
    %c0_i32_0 = arith.constant 0 : i32
    %c0_i32_1 = arith.constant 0 : i32
    return %c0_i32, %c0_i32_0 : i32, i32
  }
  func.func @transform_1(%arg0: i32) -> (i32, i32) {
    %c0_i32 = arith.constant 0 : i32
    %c0_i32_0 = arith.constant 0 : i32
    %c0_i32_1 = arith.constant 0 : i32
    return %c0_i32, %c0_i32_0 : i32, i32
  }
  func.func @transform_2(%arg0: i32) -> (i32, i32) {
    %c0_i32 = arith.constant 0 : i32
    %c0_i32_0 = arith.constant 0 : i32
    %c0_i32_1 = arith.constant 0 : i32
    return %c0_i32, %c0_i32_0 : i32, i32
  }
  func.func @transform_3(%arg0: i32) -> (i32, i32) {
    %c0_i32 = arith.constant 0 : i32
    %c0_i32_0 = arith.constant 0 : i32
    %c0_i32_1 = arith.constant 0 : i32
    return %c0_i32, %c0_i32_0 : i32, i32
  }
  func.func @transform_4(%arg0: i32) -> (i32, i32) {
    %c0_i32 = arith.constant 0 : i32
    %c0_i32_0 = arith.constant 0 : i32
    %c0_i32_1 = arith.constant 0 : i32
    return %c0_i32, %c0_i32_0 : i32, i32
  }
  func.func @transform_5(%arg0: i32) -> (i32, i32) {
    %c0_i32 = arith.constant 0 : i32
    %c0_i32_0 = arith.constant 0 : i32
    %c0_i32_1 = arith.constant 0 : i32
    return %c0_i32, %c0_i32_0 : i32, i32
  }
  func.func @transform_6(%arg0: i32) -> (i32, i32) {
    %c0_i32 = arith.constant 0 : i32
    %c0_i32_0 = arith.constant 0 : i32
    %c0_i32_1 = arith.constant 0 : i32
    return %c0_i32, %c0_i32_0 : i32, i32
  }
}

</mosaic_0001>

<bundles_post_ra>
// kernel: tpu_custom_call.1
= control target key start
LH: loop header
LB: loop body
LE: loop exit
PB: predicated region body
PF: predicated region fallthrough
CT: control target
= control target key end

     0   :  { %11 = vsyncpa [#allocation3], 0  ;;  %s753_s0 = inlined_call_operand.hbm [shape: f32[24,64], index: 0, kind: input, shape index: {}]   ;;  %s754_s1 = inlined_call_operand.vmem [shape: s32[1,24], index: 1, kind: input, shape index: {}]   ;;  %s755_s2 = inlined_call_operand.vmem [shape: f32[1,64], index: 2, kind: input, shape index: {}]   ;;  %s756_s3 = inlined_call_operand.vmem [shape: f32[1,64], index: 3, kind: input, shape index: {}]   ;;  %s757_s4 = inlined_call_operand.vmem [shape: f32[1,64], index: 4, kind: input, shape index: {}]   ;;  %s758_s5 = inlined_call_operand.vmem [shape: f32[3,1], index: 5, kind: input, shape index: {}]   ;;  %s759_s6 = inlined_call_operand.hbm [shape: f32[24,64], index: 6, kind: output, shape index: {}]  }
   0x1   :  { %12 = vsyncpa [#allocation4], 0  ;;  %s617_s21 = smov [#allocation2]   ;;  %s569_s25 = scalar_lea.hbm %s753_s0, 384 }
   0x2   :  { %s18_s22 = sshll.u32 %s617_s21, 4  ;;  %p570_p0 = scmp.ne.s32.totalorder %s753_s0, %s569_s25  ;;  %s19_s22 = int_to_ptr.vmem [resolvable:$true] %s18_s22 }
   0x3   :  { %p573_p1 = scmp.lt.u32.totalorder %s569_s25, %s753_s0 }
   0x5   :  { %p575_p2 = pnand %p573_p1, %p570_p0 }
   0x7   :  { %578 = shalt.err (!%p575_p2)
}
   0x8   :  { %s579_s30 = scalar_lea.vmem %s19_s22, 384  ;;  %p584_p4 = scmp.lt.s32.totalorder %s19_s22, %s19_s22 }
   0x9   :  { %p580_p3 = scmp.ne.s32.totalorder %s19_s22, %s579_s30  ;;  %p585_p5 = scmp.lt.s32.totalorder %s579_s30, %s579_s30 }
   0xb   :  { %p586_p6 = por %p585_p5, %p584_p4 }
   0xd   :  { %p587_p7 = pnand %p586_p6, %p580_p3 }
   0xf   :  { %590 = shalt.err (!%p587_p7)
}
  0x10   :  { %s618_s7 = smov 128   ;;  %s619_s8 = smov 8  }
  0x11   :  { %24 = dma.hbm_to_vmem [thread:$0]  %s753_s0, 384, %s19_s22, [#allocation3], %s618_s7, %s618_s7, %s619_s8  }
  0x12   :  { %613 = dma.done.wait [#allocation3], 384  }
  0x13   :  { %614 = vsyncadd [#allocation3], 4294966912  ;;  %v620_v0 = vmov 0.0|0.0   ;;  %v42_v1 = vlaneseq  ;;  %vm621_vm0 = vmmov 0   ;;  %v622_v2 = vmov 0.0   ;;  %v679_v5 = vld [vmem:[#allocation2] sm:$0xff] }
  0x14   :  { %552 = vmatprep.subr.bf16.mxu0 %v620_v0  ;;  %555 = vmatprep.subr.bf16.mxu1 %v620_v0  ;;  %v623_v3 = vmov 0   ;;  %v681_v6 = vld [vmem:[#allocation2 + $0x8] sm:$0xff]  ;;  %v125_v8 = vmul.f32 %v679_v5, %v679_v5  ;;  %v482_v10 = vld [vmem:[%s754_s1] ss:$0 sm:$0xff]  ;;  %v695_v12 = vld [vmem:[#allocation2 + $0x10] sm:$0xff]  ;;  %vm51_vm2 = vcmask 195584  }
  0x15   :  { %518 = vmatprep.mubr.msk.f32.mxu0 %vm621_vm0, %v622_v2  ;;  %527 = vmatprep.mubr.msk.f32.mxu1 %vm621_vm0, %v622_v2  ;;  %v43_v4 = vshrl.u32 %v42_v1, 7  ;;  %v553_v7 = vpack.c.bf16 %v681_v6, %v679_v5  ;;  %v126_v9 = vmul.f32 %v681_v6, %v681_v6  ;;  %v201_v11 = vld [vmem:[%s758_s5] sm:$0x7]  ;;  %v127_v15 = vmul.f32 %v695_v12, %v695_v12 }
  0x16   :  { %566 = vset.pattern.permute.xlu0 %v623_v3  ;;  %v200_v16 = vld [vmem:[%s757_s4] sm:$0x1]  ;;  %vm288_vm3 = vcmask 1042432   ;;  %vm278_vm4 = vcmask 23552   ;;  %vm461_vm5 = vcmask 523264  }
  0x17   :  { %vm48_vm1 = vcmp.eq.s32.totalorder %v43_v4, %v482_v10  ;;  %204 = vperm.xlu0 %566, %v201_v11   ;;  %554 = vmatpush3.bf16.msra.mxu0 %v553_v7  ;;  %v556_v13 = vpack.c.bf16 %v126_v9, %v125_v8  ;;  %v209_v17 = vmul.f32 2.0, %v200_v16  ;;  %v210_v18 = vmul.f32 %v200_v16, %v200_v16  ;;  %v486_v35 = vld [vmem:[%s755_s2] ss:$0 sm:$0xff]  ;;  %s624_s2 = smov [#allocation5]  }
  0x18   :  { %516 = vmatprep.subr.mxu0 %v622_v2  ;;  %v483_v14 = vsel %vm48_vm1, 1.0, %v622_v2  ;;  %v215_v19 = vsub.s32 0, %v43_v4  ;;  %v487_v41 = vld [vmem:[%s756_s3] ss:$0 sm:$0xff]  ;;  %s470_s3 = sshll.u32 %s624_s2, 4  ;;  %s471_s3 = int_to_ptr.vmem [resolvable:$true] %s470_s3 }
  0x19   :  { %557 = vmatpush3.bf16.msra.mxu1 %v556_v13  ;;  %v211_v20 = vsub.f32 %v209_v17, %v210_v18  ;;  %s591_s17 = scalar_lea.vmem %s471_s3, 384  ;;  %p596_p9 = scmp.lt.s32.totalorder %s471_s3, %s471_s3 }
  0x1a   :  { %525 = vmatprep.subr.mxu1 %v622_v2  ;;  %v235_v36 = vrot.slane %v200_v16, %v215_v19  ;;  %p592_p8 = scmp.ne.s32.totalorder %s471_s3, %s591_s17  ;;  %p597_p10 = scmp.lt.s32.totalorder %s591_s17, %s591_s17 }
  0x1b   :  { %517 = vmatpush3.msra.mxu0 %v695_v12  ;;  %v216_v22 = vrot.slane %v211_v20, %v215_v19 }
  0x1c   :  { %519 = vmatmul.mubr.msk.f32.vlgmr.msra.gmra.mrb[0].mxu0 %vm51_vm2, %v483_v14  ;;  %530 = vmatprep.subr.mxu0 %v622_v2  ;;  %p598_p11 = por %p597_p10, %p596_p9 }
  0x1d   :  { %526 = vmatpush3.msra.mxu1 %v127_v15  ;;  %532 = vmatprep.mubr.msk.f32.mxu0 %vm621_vm0, %v622_v2 }
  0x1e   :  { %528 = vmatmul.mubr.msk.f32.vlgmr.msra.gmra.mrb[0].mxu1 %vm51_vm2, %v483_v14  ;;  %541 = vmatprep.subr.mxu1 %v622_v2  ;;  %p599_p12 = pnand %p598_p11, %p592_p8 }
  0x1f   :  { %543 = vmatprep.mubr.msk.f32.mxu1 %vm621_vm0, %v622_v2 }
  0x35   :  { %246 = vxpose.xlu0.b32.start.end [1/1] (short) (narrow) %v483_v14, 24 }
  0x96   :  { %v205_v21 = vpop.permute.xlu0 %204 }
  0xb5   :  { %v262_v34 = vpop.trf.xlu0 }
  0xb9   :  { %v263_v40 = vpop.trf.xlu0 }
  0xbd   :  { %v264_v44 = vpop.trf.xlu0 }
  0xef   :  { %v121_v23 = vpop.f32.mrb[0].mxu0 }
  0xf0   :  { %v207_v24 = vmul.f32 %v205_v21, %v121_v23  ;;  %v520_v25 = vpop.f32.mrb[1].mxu0 }
  0xf1   :  { %v194_v26 = vpop.f32.mrb[0].mxu1 }
  0xf2   :  { %v218_v27 = vmul.f32 %v216_v22, %v207_v24  ;;  %v529_v28 = vpop.f32.mrb[1].mxu1  ;;  %v208_v29 = vmul.f32 %v205_v21, %v194_v26 }
  0xf4   :  { %v219_v30 = vmul.f32 %v218_v27, %v207_v24 }
  0xf6   :  { %v220_v31 = vsub.f32 %v208_v29, %v219_v30 }
  0xf8   :  { %v221_v32 = vmax.f32 %v220_v31, 0.0 }
  0xfa   :  { %v222_v33 = vadd.f32 1e-06, %v221_v32 }
  0xfc   :  { %567 = vrsqrt.f32 %v222_v33 }
 0x106   :  { %v568_v37 = vpop.eup %567 }
 0x107   :  { %v230_v38 = vmul.f32 %v568_v37, %v486_v35 }
 0x109   :  { %v237_v39 = vmul.f32 %v235_v36, %v230_v38  ;;  %531 = vmatpush3.msk.msra.mxu0 %vm288_vm3, %v230_v38 }
 0x10a   :  { %533 = vmatmul.mubr.msk.f32.vlgmr.msra.gmra.mrb[2].mxu0 %vm278_vm4, %v262_v34 }
 0x10b   :  { %v238_v42 = vmul.f32 %v237_v39, %v207_v24  ;;  %535 = vmatprep.mubr.msk.f32.mxu0 %vm621_vm0, %v622_v2 }
 0x10d   :  { %v245_v43 = vsub.f32 %v487_v41, %v238_v42 }
 0x10e   :  { %536 = vmatmul.mubr.msk.f32.gmra.mrb[4].mxu0 %vm278_vm4, %v263_v40 }
 0x10f   :  { %542 = vmatpush3.msk.msra.mxu1 %vm288_vm3, %v245_v43  ;;  %538 = vmatprep.mubr.msk.f32.mxu0 %vm621_vm0, %v622_v2 }
 0x110   :  { %544 = vmatmul.mubr.msk.f32.vlgmr.msra.gmra.mrb[2].mxu1 %vm278_vm4, %v262_v34 }
 0x111   :  { %546 = vmatprep.mubr.msk.f32.mxu1 %vm621_vm0, %v622_v2 }
 0x112   :  { %539 = vmatmul.mubr.msk.f32.gmra.mrb[6].mxu0 %vm278_vm4, %v264_v44 }
 0x114   :  { %547 = vmatmul.mubr.msk.f32.gmra.mrb[4].mxu1 %vm278_vm4, %v263_v40 }
 0x115   :  { %549 = vmatprep.mubr.msk.f32.mxu1 %vm621_vm0, %v622_v2 }
 0x118   :  { %550 = vmatmul.mubr.msk.f32.gmra.mrb[6].mxu1 %vm278_vm4, %v264_v44 }
 0x1dd   :  { %v358_v45 = vpop.f32.mrb[2].mxu0 }
 0x1de   :  { %v534_v46 = vpop.f32.mrb[3].mxu0  ;;  %v455_v47 = vmul.f32 %v358_v45, %v679_v5 }
 0x1e1   :  { %v363_v48 = vpop.f32.mrb[4].mxu0 }
 0x1e2   :  { %v537_v49 = vpop.f32.mrb[5].mxu0  ;;  %v456_v53 = vmul.f32 %v363_v48, %v681_v6 }
 0x1e3   :  { %v441_v50 = vpop.f32.mrb[2].mxu1 }
 0x1e4   :  { %v458_v51 = vadd.f32 %v455_v47, %v441_v50  ;;  %v545_v52 = vpop.f32.mrb[3].mxu1 }
 0x1e5   :  { %v368_v54 = vpop.f32.mrb[6].mxu0 }
 0x1e6   :  { %462 = vst.msk [vmem:[#allocation5] sm:$0xff] %vm461_vm5, %v458_v51  ;;  %v540_v55 = vpop.f32.mrb[7].mxu0  ;;  %v457_v59 = vmul.f32 %v368_v54, %v695_v12 }
 0x1e7   :  { %v446_v56 = vpop.f32.mrb[4].mxu1 }
 0x1e8   :  { %v459_v57 = vadd.f32 %v456_v53, %v446_v56  ;;  %v548_v58 = vpop.f32.mrb[5].mxu1 }
 0x1ea   :  { %463 = vst.msk [vmem:[#allocation5 + $0x8] sm:$0xff] %vm461_vm5, %v459_v57 }
 0x1eb   :  { %v451_v60 = vpop.f32.mrb[6].mxu1 }
 0x1ec   :  { %v460_v61 = vadd.f32 %v457_v59, %v451_v60  ;;  %v551_v62 = vpop.f32.mrb[7].mxu1 }
 0x1ee   :  { %464 = vst.msk [vmem:[#allocation5 + $0x10] sm:$0xff] %vm461_vm5, %v460_v61 }
 0x1ef   :  { %602 = shalt.err (!%p599_p12)
}
 0x1f0   :  { %s603_s20 = scalar_lea.hbm %s759_s6, 384 }
 0x1f1   :  { %p604_p13 = scmp.ne.s32.totalorder %s759_s6, %s603_s20  ;;  %p607_p0 = scmp.lt.u32.totalorder %s603_s20, %s759_s6 }
 0x1f3   :  { %p609_p1 = pnand %p607_p0, %p604_p13 }
 0x1f5   :  { %612 = shalt.err (!%p609_p1)
}
 0x1f6   :  { %476 = dma.vmem_to_hbm [thread:$0]  %s471_s3, 384, %s759_s6, [#allocation4], %s618_s7, %s618_s7, %s619_s8  }
 0x1f7   :  { %615 = dma.done.wait [#allocation4], 384  }
 0x1f8   :  { %616 = vsyncadd [#allocation4], 4294966912 }
 0x1f9   :  { %480 = vsyncpa [#allocation3], 1 }
 0x1fa   :  { %481 = vsyncpa [#allocation4], 1 }

</bundles_post_ra>
